<compile_context>
chip_gen: v6e
topology: v6e:2x2x1
jax: 0.10.0
libtpu: 0.0.40
codegen_flags: <defaults>
</compile_context>

<pallas_src>
import functools

import jax
import jax.numpy as jnp
from jax.experimental import pallas as pl
from jax.experimental.pallas import tpu as pltpu

LANE = 128


def _round_up(v, m):
    return (v + m - 1) // m * m


def _vmem_budget_bytes():
    """~85% of this generation's physical VMEM, conservative fallback."""
    try:
        info = pltpu.get_tpu_info()
        cap = getattr(info, "vmem_capacity_bytes", None)
        if cap:
            return int(cap * 0.85)
    except Exception:
        pass
    return 48 << 20


# --------------------------------------------------------------------------
# Kernel A: layer 0,  h0 = relu(adj @ (x @ W0) + b0)
# Grid axis = K-tiles of the input-feature contraction ("arbitrary").
#   x_ref   : (Np, TK)   bf16   K-tile of input features (streamed)
#   adj_ref : (Np, Np)   bf16   dense normalized adjacency (resident)
#   w_ref   : (TK, Gp)   bf16   K-tile of layer-0 weight (streamed)
#   b_ref   : (1,  Gp)   f32    layer-0 bias
#   h_ref   : (Np, Gp)   bf16   output activation (written at last K step)
#   acc_ref : (Np, Gp)   f32    VMEM accumulator for support = x @ W0
# --------------------------------------------------------------------------
def _gcn_layer0_kernel(x_ref, adj_ref, w_ref, b_ref, h_ref, acc_ref):
    k = pl.program_id(0)

    @pl.when(k == 0)
    def _():
        acc_ref[...] = jnp.zeros_like(acc_ref)

    acc_ref[...] += jnp.dot(x_ref[...], w_ref[...],
                            preferred_element_type=jnp.float32)

    @pl.when(k == pl.num_programs(0) - 1)
    def _():
        out = jnp.dot(adj_ref[...], acc_ref[...].astype(jnp.bfloat16),
                      preferred_element_type=jnp.float32)
        out = out + b_ref[...]                     # f32 epilogue (v5e-safe)
        h_ref[...] = jnp.maximum(out, 0.0).astype(h_ref.dtype)


# --------------------------------------------------------------------------
# Kernel B: fused layers 1..L-1.  Grid axis = layer index ("arbitrary").
#   h0_hbm  : (Np, Gp)   bf16   layer-0 activation, left in HBM (pl.ANY);
#                               copied into the VMEM scratch once at step 0.
#   adj_ref : (Np, Np)   bf16   adjacency, resident in VMEM (DMA'd once)
#   w_ref   : (Gp, Gp)   bf16   this layer's zero-padded weight (streamed)
#   b_ref   : (1,  Gp)   f32    this layer's zero-padded bias (streamed)
#   o_ref   : (Np, Cp)   f32    log-softmax output (written at last layer)
#   h_ref   : (Np, Gp)   bf16   VMEM scratch holding the current activation
# --------------------------------------------------------------------------
def _gcn_tail_kernel(h0_hbm, adj_ref, w_ref, b_ref, o_ref, h_ref, *,
                     nclass, nclass_p):
    layer = pl.program_id(0)
    last = pl.num_programs(0) - 1

    @pl.when(layer == 0)
    def _():
        pltpu.sync_copy(h0_hbm, h_ref)       # one-shot HBM -> VMEM copy

    # support = h @ W  (bf16 MXU inputs, f32 accumulation)
    support = jnp.dot(h_ref[...], w_ref[...],
                      preferred_element_type=jnp.float32)
    # out = adj @ support + b
    out = jnp.dot(adj_ref[...], support.astype(jnp.bfloat16),
                  preferred_element_type=jnp.float32)
    out = out + b_ref[...]                   # f32 epilogue

    @pl.when(layer < last)
    def _():
        # ReLU (dropout = identity in inference mode).  Zero-padded feature
        # columns stay exactly zero, so padding never leaks into real outputs.
        h_ref[...] = jnp.maximum(out, 0.0).astype(h_ref.dtype)

    @pl.when(layer == last)
    def _():
        # log_softmax over the real class columns only (padded cols masked);
        # epilogue runs over the narrow Cp slab, not the full hidden width.
        logits = out[:, :nclass_p]
        col = jax.lax.broadcasted_iota(jnp.int32, logits.shape, 1)
        masked = jnp.where(col < nclass, logits, jnp.float32(-1e30))
        m = jnp.max(masked, axis=1, keepdims=True)
        shifted = masked - m
        lse = jnp.log(jnp.sum(jnp.exp(shifted), axis=1, keepdims=True))
        o_ref[...] = (shifted - lse).astype(o_ref.dtype)


# --------------------------------------------------------------------------
# Wrapper: per-layer padding, two shape-specialized pallas_calls.
# --------------------------------------------------------------------------
def gcn_forward(params, x, adj, dropout_rate=0.0):
    del dropout_rate  # inference semantics (see TODO above)

    n, nfeat = x.shape
    nlayers = len(params)
    assert nlayers >= 2, "GCN wrapper expects at least 2 GraphConvolution layers"
    nclass = params[-1][0].shape[1]

    # Padded dims: nodes + layer-0 input padded to 128 lanes; all hidden/class
    # widths share one narrow padded width Gp; output narrowed to Cp.
    np_ = _round_up(n, LANE)
    f0p = _round_up(nfeat, LANE)
    gp = _round_up(max([w.shape[1] for (w, _) in params]
                       + [w.shape[0] for (w, _) in params[1:]]), LANE)
    cp = _round_up(nclass, LANE)

    # K-tile for the layer-0 contraction over the (possibly wide) feature dim.
    if f0p <= 512:
        tk0 = f0p
    else:
        tk0 = 128
        for cand in (512, 384, 256):
            if f0p % cand == 0:
                tk0 = cand
                break
    kt = f0p // tk0

    # ---- zero-padded, dtype-converted operands -----------------------------
    x_p = (jnp.zeros((np_, f0p), jnp.float32).at[:n, :nfeat].set(x)
           .astype(jnp.bfloat16))
    adj_p = (jnp.zeros((np_, np_), jnp.float32).at[:n, :n].set(adj)
             .astype(jnp.bfloat16))

    w0, b0 = params[0]
    w0_p = (jnp.zeros((f0p, gp), jnp.float32)
            .at[:w0.shape[0], :w0.shape[1]].set(w0).astype(jnp.bfloat16))
    b0_p = jnp.zeros((1, gp), jnp.float32).at[0, :b0.shape[0]].set(b0)

    w_stack = jnp.stack([
        jnp.zeros((gp, gp), jnp.float32).at[:w.shape[0], :w.shape[1]].set(w)
        for (w, _) in params[1:]]).astype(jnp.bfloat16)
    b_stack = jnp.stack([
        jnp.zeros((1, gp), jnp.float32).at[0, :b.shape[0]].set(b)
        for (_, b) in params[1:]])

    # ---- per-generation VMEM budget + residency guard -----------------------
    vmem_limit = _vmem_budget_bytes()
    res_a = (np_ * np_ * 2            # adj resident
             + 2 * np_ * tk0 * 2      # x K-tiles, double-buffered
             + 2 * tk0 * gp * 2       # W0 K-tiles, double-buffered
             + 2 * gp * 4             # bias
             + np_ * gp * 4           # f32 accumulator
             + 2 * np_ * gp * 2)      # h0 output buffers
    res_b = (np_ * np_ * 2            # adj resident
             + np_ * gp * 2           # bf16 activation scratch
             + 2 * np_ * cp * 4       # narrow f32 output
             + 2 * gp * gp * 2        # streamed W, double-buffered
             + 2 * gp * 4)            # streamed bias
    assert max(res_a, res_b) <= vmem_limit, (
        "GCN resident working set (%d bytes) exceeds the VMEM budget (%d); "
        "the row-tiled adj streaming fallback is not implemented yet."
        % (max(res_a, res_b), vmem_limit))
    # TODO(synk): row-tiled adj fallback + 'parallel' row axis for v7x dual-TC.

    compiler_params = pltpu.CompilerParams(
        dimension_semantics=("arbitrary",),
        vmem_limit_bytes=int(vmem_limit),
    )

    # ---- kernel A: layer 0 ---------------------------------------------------
    nhid0 = w0.shape[1]
    cost_a = pl.CostEstimate(
        flops=2 * n * nfeat * nhid0 + 2 * n * n * nhid0,
        transcendentals=0,
        bytes_accessed=(x_p.size * 2 + adj_p.size * 2 + w0_p.size * 2
                        + b0_p.size * 4 + np_ * gp * 2))
    h0 = pl.pallas_call(
        _gcn_layer0_kernel,
        out_shape=jax.ShapeDtypeStruct((np_, gp), jnp.bfloat16),
        grid_spec=pltpu.PrefetchScalarGridSpec(
            num_scalar_prefetch=0,
            grid=(kt,),
            in_specs=[
                pl.BlockSpec((np_, tk0), lambda k: (0, k)),   # x K-tile
                pl.BlockSpec((np_, np_), lambda k: (0, 0)),   # adj resident
                pl.BlockSpec((tk0, gp), lambda k: (k, 0)),    # W0 K-tile
                pl.BlockSpec((1, gp), lambda k: (0, 0)),      # b0
            ],
            out_specs=pl.BlockSpec((np_, gp), lambda k: (0, 0)),
            scratch_shapes=[pltpu.VMEM((np_, gp), jnp.float32)],
        ),
        compiler_params=compiler_params,
        cost_estimate=cost_a,
    )(x_p, adj_p, w0_p, b0_p)

    # ---- kernel B: fused layers 1..L-1 --------------------------------------
    flops_b = 0
    for (w, _) in params[1:]:
        fi, fo = w.shape
        flops_b += 2 * n * fi * fo + 2 * n * n * fo
    cost_b = pl.CostEstimate(
        flops=flops_b,
        transcendentals=n * (nclass + 1),
        bytes_accessed=(np_ * gp * 2 + adj_p.size * 2 + w_stack.size * 2
                        + b_stack.size * 4 + np_ * cp * 4))

    tail_kernel = functools.partial(_gcn_tail_kernel, nclass=nclass, nclass_p=cp)
    out_p = pl.pallas_call(
        tail_kernel,
        out_shape=jax.ShapeDtypeStruct((np_, cp), jnp.float32),
        grid_spec=pltpu.PrefetchScalarGridSpec(
            num_scalar_prefetch=0,
            grid=(nlayers - 1,),
            in_specs=[
                pl.BlockSpec(memory_space=pl.ANY),                  # h0 in HBM
                pl.BlockSpec((np_, np_), lambda l: (0, 0)),         # adj resident
                pl.BlockSpec((None, gp, gp), lambda l: (l, 0, 0)),  # W_l streamed
                pl.BlockSpec((None, 1, gp), lambda l: (l, 0, 0)),   # b_l streamed
            ],
            out_specs=pl.BlockSpec((np_, cp), lambda l: (0, 0)),
            scratch_shapes=[pltpu.VMEM((np_, gp), jnp.bfloat16)],
        ),
        compiler_params=compiler_params,
        cost_estimate=cost_b,
    )(h0, adj_p, w_stack, b_stack)

    return out_p[:n, :nclass]


# --------------------------------------------------------------------------
# Parameter init mirroring GraphConvolution's uniform(-1/sqrt(fo), 1/sqrt(fo))
# --------------------------------------------------------------------------
def init_gcn_params(key, nfeat, nhid, nclass, nlayers):
    dims = [(nfeat, nhid)] + [(nhid, nhid)] * (nlayers - 2) + [(nhid, nclass)]
    params = []
    for (fi, fo) in dims:
        key, kw, kb = jax.random.split(key, 3)
        stdv = 1.0 / jnp.sqrt(jnp.float32(fo))
        w = jax.random.uniform(kw, (fi, fo), jnp.float32, -stdv, stdv)
        b = jax.random.uniform(kb, (fo,), jnp.float32, -stdv, stdv)
        params.append((w, b))
    return params


# --------------------------------------------------------------------------
# Pure-JAX references for sanity checks
# --------------------------------------------------------------------------
def gcn_forward_ref_f32(params, x, adj):
    h = x
    for (w, b) in params[:-1]:
        h = jax.nn.relu(adj @ (h @ w) + b)
    w, b = params[-1]
    h = adj @ (h @ w) + b
    return jax.nn.log_softmax(h, axis=1)


def gcn_forward_ref_bf16(params, x, adj):
    # Mirrors the kernel's mixed precision (bf16 matmul inputs, f32 accum).
    h = x
    adj_b = adj.astype(jnp.bfloat16)

    def layer(h, w, b):
        s = jnp.dot(h.astype(jnp.bfloat16), w.astype(jnp.bfloat16),
                    preferred_element_type=jnp.float32)
        return jnp.dot(adj_b, s.astype(jnp.bfloat16),
                       preferred_element_type=jnp.float32) + b

    for (w, b) in params[:-1]:
        h = jax.nn.relu(layer(h, w, b))
    w, b = params[-1]
    return jax.nn.log_softmax(layer(h, w, b), axis=1)


if __name__ == "__main__":
    key = jax.random.PRNGKey(0)
    N, nfeat, nhid, nclass, nlayers = 16, 8, 32, 4, 3
    dropout = 0.5

    key, kx, ka, kp = jax.random.split(key, 4)
    x = jax.random.normal(kx, (N, nfeat), jnp.float32)
    # simple symmetric row-normalized adjacency with self loops
    a = (jax.random.uniform(ka, (N, N)) < 0.3).astype(jnp.float32)
    a = jnp.clip(a + a.T + jnp.eye(N, dtype=jnp.float32), 0.0, 1.0)
    adj = a / jnp.sum(a, axis=1, keepdims=True)

    params = init_gcn_params(kp, nfeat, nhid, nclass, nlayers)

    out = gcn_forward(params, x, adj, dropout)
    out = jax.block_until_ready(out)
    assert out.shape == (N, nclass)

    ref_bf16 = gcn_forward_ref_bf16(params, x, adj)
    ref_f32 = gcn_forward_ref_f32(params, x, adj)
    assert jnp.allclose(out, ref_bf16, atol=2e-3, rtol=2e-3), \
        float(jnp.max(jnp.abs(out - ref_bf16)))
    assert jnp.allclose(out, ref_f32, atol=5e-2, rtol=5e-2), \
        float(jnp.max(jnp.abs(out - ref_f32)))

    print("KERNEL_OK")
</pallas_src>

<mosaic_0001>
module attributes {stable_mosaic.version = 11 : i64} {
  func.func @_gcn_layer0_kernel(%arg0: i32, %arg1: memref<128x128xbf16, #tpu.memory_space<vmem>>, %arg2: memref<128x128xbf16, #tpu.memory_space<vmem>>, %arg3: memref<128x128xbf16, #tpu.memory_space<vmem>>, %arg4: memref<1x128xf32, #tpu.memory_space<vmem>>, %arg5: memref<128x128xbf16, #tpu.memory_space<vmem>>, %arg6: memref<128x128xf32, #tpu.memory_space<vmem>>) attributes {dimension_semantics = [#tpu.dimension_semantics<arbitrary>], iteration_bounds = array<i64: 1>, scalar_prefetch = 0 : i64, scratch_operands = 1 : i64, tpu.core_type = #tpu.core_type<tc>, window_params = [{transform_indices = @transform_0, window_bounds = array<i64: 128, 128>}, {pipeline_mode = #tpu.pipeline_mode<synchronous>, transform_indices = @transform_1, window_bounds = array<i64: 128, 128>}, {transform_indices = @transform_2, window_bounds = array<i64: 128, 128>}, {pipeline_mode = #tpu.pipeline_mode<synchronous>, transform_indices = @transform_3, window_bounds = array<i64: 1, 128>}, {pipeline_mode = #tpu.pipeline_mode<synchronous>, transform_indices = @transform_4, window_bounds = array<i64: 128, 128>}]} {
    %c0_i32 = arith.constant 0 : i32
    %0 = arith.cmpi eq, %arg0, %c0_i32 : i32
    %1 = arith.extui %0 : i1 to i32
    %c0_i32_0 = arith.constant 0 : i32
    %2 = arith.cmpi ne, %1, %c0_i32_0 : i32
    scf.if %2 {
      %cst_10 = arith.constant 0.000000e+00 : f32
      %12 = vector.broadcast %cst_10 : f32 to vector<128x128xf32>
      %c0_11 = arith.constant 0 : index
      %c0_12 = arith.constant 0 : index
      %13 = vector.load %arg6[%c0_11, %c0_12] : memref<128x128xf32, #tpu.memory_space<vmem>>, vector<128x128xf32>
      tpu.vector_store %arg6[%c0_11, %c0_12], %12 {strides = array<i32>} : memref<128x128xf32, #tpu.memory_space<vmem>>, vector<128x128xf32>,
    } else {
    }
    %c0 = arith.constant 0 : index
    %c0_1 = arith.constant 0 : index
    %3 = vector.load %arg6[%c0, %c0_1] : memref<128x128xf32, #tpu.memory_space<vmem>>, vector<128x128xf32>
    %c0_2 = arith.constant 0 : index
    %c0_3 = arith.constant 0 : index
    %4 = vector.load %arg1[%c0_2, %c0_3] : memref<128x128xbf16, #tpu.memory_space<vmem>>, vector<128x128xbf16>
    %c0_4 = arith.constant 0 : index
    %c0_5 = arith.constant 0 : index
    %5 = vector.load %arg3[%c0_4, %c0_5] : memref<128x128xbf16, #tpu.memory_space<vmem>>, vector<128x128xbf16>
    %cst = arith.constant dense<0.000000e+00> : vector<128x128xf32>
    %6 = tpu.matmul %4, %5, %cst {dimension_numbers = #tpu.dot_dimension_numbers<[1], [0], [0], [1], [0, 0, 1, 1], [], []>} : vector<128x128xbf16>, vector<128x128xbf16>, vector<128x128xf32> -> vector<128x128xf32>
    %7 = arith.addf %3, %6 : vector<128x128xf32>
    %c0_6 = arith.constant 0 : index
    %c0_7 = arith.constant 0 : index
    %8 = vector.load %arg6[%c0_6, %c0_7] : memref<128x128xf32, #tpu.memory_space<vmem>>, vector<128x128xf32>
    tpu.vector_store %arg6[%c0_6, %c0_7], %7 {strides = array<i32>} : memref<128x128xf32, #tpu.memory_space<vmem>>, vector<128x128xf32>,
    %c0_i32_8 = arith.constant 0 : i32
    %9 = arith.cmpi eq, %arg0, %c0_i32_8 : i32
    %10 = arith.extui %9 : i1 to i32
    %c0_i32_9 = arith.constant 0 : i32
    %11 = arith.cmpi ne, %10, %c0_i32_9 : i32
    scf.if %11 {
      %c0_10 = arith.constant 0 : index
      %c0_11 = arith.constant 0 : index
      %12 = vector.load %arg2[%c0_10, %c0_11] : memref<128x128xbf16, #tpu.memory_space<vmem>>, vector<128x128xbf16>
      %c0_12 = arith.constant 0 : index
      %c0_13 = arith.constant 0 : index
      %13 = vector.load %arg6[%c0_12, %c0_13] : memref<128x128xf32, #tpu.memory_space<vmem>>, vector<128x128xf32>
      %14 = arith.truncf %13 : vector<128x128xf32> to vector<128x128xbf16>
      %cst_14 = arith.constant dense<0.000000e+00> : vector<128x128xf32>
      %15 = tpu.matmul %12, %14, %cst_14 {dimension_numbers = #tpu.dot_dimension_numbers<[1], [0], [0], [1], [0, 0, 1, 1], [], []>} : vector<128x128xbf16>, vector<128x128xbf16>, vector<128x128xf32> -> vector<128x128xf32>
      %c0_15 = arith.constant 0 : index
      %c0_16 = arith.constant 0 : index
      %16 = vector.load %arg4[%c0_15, %c0_16] : memref<1x128xf32, #tpu.memory_space<vmem>>, vector<1x128xf32>
      %17 = vector.broadcast %16 : vector<1x128xf32> to vector<128x128xf32>
      %18 = arith.addf %15, %17 : vector<128x128xf32>
      %cst_17 = arith.constant 0.000000e+00 : f32
      %19 = vector.broadcast %cst_17 : f32 to vector<128x128xf32>
      %20 = arith.maximumf %18, %19 : vector<128x128xf32>
      %21 = arith.truncf %20 : vector<128x128xf32> to vector<128x128xbf16>
      %c0_18 = arith.constant 0 : index
      %c0_19 = arith.constant 0 : index
      %22 = vector.load %arg5[%c0_18, %c0_19] : memref<128x128xbf16, #tpu.memory_space<vmem>>, vector<128x128xbf16>
      tpu.vector_store %arg5[%c0_18, %c0_19], %21 {strides = array<i32>} : memref<128x128xbf16, #tpu.memory_space<vmem>>, vector<128x128xbf16>,
    } else {
    }
    return
  }
  func.func @transform_0(%arg0: i32) -> (i32, i32) {
    %c0_i32 = arith.constant 0 : i32
    %c0_i32_0 = arith.constant 0 : i32
    return %c0_i32, %arg0 : i32, i32
  }
  func.func @transform_1(%arg0: i32) -> (i32, i32) {
    %c0_i32 = arith.constant 0 : i32
    %c0_i32_0 = arith.constant 0 : i32
    %c0_i32_1 = arith.constant 0 : i32
    return %c0_i32, %c0_i32_0 : i32, i32
  }
  func.func @transform_2(%arg0: i32) -> (i32, i32) {
    %c0_i32 = arith.constant 0 : i32
    %c0_i32_0 = arith.constant 0 : i32
    return %arg0, %c0_i32 : i32, i32
  }
  func.func @transform_3(%arg0: i32) -> (i32, i32) {
    %c0_i32 = arith.constant 0 : i32
    %c0_i32_0 = arith.constant 0 : i32
    %c0_i32_1 = arith.constant 0 : i32
    return %c0_i32, %c0_i32_0 : i32, i32
  }
  func.func @transform_4(%arg0: i32) -> (i32, i32) {
    %c0_i32 = arith.constant 0 : i32
    %c0_i32_0 = arith.constant 0 : i32
    %c0_i32_1 = arith.constant 0 : i32
    return %c0_i32, %c0_i32_0 : i32, i32
  }
}

</mosaic_0001>

<bundles_post_ra>
// kernel: tpu_custom_call.1
= control target key start
LH: loop header
LB: loop body
LE: loop exit
PB: predicated region body
PF: predicated region fallthrough
CT: control target
= control target key end

     0   :  { %9 = vsyncpa [#allocation4], 0  ;;  %s1036_s0 = inlined_call_operand.hbm [shape: bf16[128,128], index: 0, kind: input, shape index: {}]   ;;  %s1037_s1 = inlined_call_operand.hbm [shape: bf16[128,128], index: 1, kind: input, shape index: {}]   ;;  %s1038_s2 = inlined_call_operand.hbm [shape: bf16[128,128], index: 2, kind: input, shape index: {}]   ;;  %s1039_s3 = inlined_call_operand.vmem [shape: f32[1,128], index: 3, kind: input, shape index: {}]   ;;  %s1040_s4 = inlined_call_operand.hbm [shape: bf16[128,128], index: 4, kind: output, shape index: {}]  }
   0x1   :  { %10 = vsyncpa [#allocation7], 0 }
   0x2   :  { %11 = vsyncpa [#allocation5], 0  ;;  %s978_s15 = smov [#allocation6]   ;;  %s979_s17 = smov [#allocation3]  }
   0x3   :  { %s29_s16 = sshll.u32 %s978_s15, 4  ;;  %s17_s18 = sshll.u32 %s979_s17, 4  ;;  %s30_s16 = int_to_ptr.vmem [resolvable:$true] %s29_s16  ;;  %s18_s18 = int_to_ptr.vmem [resolvable:$true] %s17_s18 }
   0x4   :  { %s900_s19 = scalar_lea.vmem %s30_s16, 1024  ;;  %p905_p1 = scmp.lt.s32.totalorder %s30_s16, %s30_s16 }
   0x5   :  { %p901_p0 = scmp.ne.s32.totalorder %s30_s16, %s900_s19  ;;  %p906_p2 = scmp.lt.s32.totalorder %s900_s19, %s900_s19 }
   0x7   :  { %p907_p3 = por %p906_p2, %p905_p1 }
   0x9   :  { %p908_p4 = pnand %p907_p3, %p901_p0 }
   0xb   :  { %911 = shalt.err (!%p908_p4)
}
   0xc   :  { %s980_s20 = smov 64   ;;  %s981_s21 = smov 4  }
   0xd   :  { %35 = dma.hbm_to_vmem [thread:$0]  %s1037_s1, 1024, %s30_s16, [#allocation7], %s980_s20, %s980_s20, %s981_s21  }
   0xe   :  { %s920_s24 = scalar_lea.vmem %s18_s18, 1024  ;;  %p925_p6 = scmp.lt.s32.totalorder %s18_s18, %s18_s18 }
   0xf   :  { %p921_p5 = scmp.ne.s32.totalorder %s18_s18, %s920_s24  ;;  %p926_p7 = scmp.lt.s32.totalorder %s920_s24, %s920_s24 }
  0x11   :  { %p927_p8 = por %p926_p7, %p925_p6 }
  0x13   :  { %p928_p9 = pnand %p927_p8, %p921_p5 }
  0x15   :  { %931 = shalt.err (!%p928_p9)
}
  0x16   :  { %23 = dma.hbm_to_vmem [thread:$0]  %s1036_s0, 1024, %s18_s18, [#allocation4], %s980_s20, %s980_s20, %s981_s21  }
  0x17   :  { %s982_s27 = smov [#allocation8]  }
  0x18   :  { %s41_s28 = sshll.u32 %s982_s27, 4  ;;  %s42_s28 = int_to_ptr.vmem [resolvable:$true] %s41_s28 }
  0x19   :  { %s940_s29 = scalar_lea.vmem %s42_s28, 1024  ;;  %p945_p11 = scmp.lt.s32.totalorder %s42_s28, %s42_s28 }
  0x1a   :  { %p941_p10 = scmp.ne.s32.totalorder %s42_s28, %s940_s29  ;;  %p946_p12 = scmp.lt.s32.totalorder %s940_s29, %s940_s29 }
  0x1c   :  { %p947_p13 = por %p946_p12, %p945_p11 }
  0x1e   :  { %p948_p0 = pnand %p947_p13, %p941_p10 }
  0x20   :  { %951 = shalt.err (!%p948_p0)
}
  0x21   :  { %47 = dma.hbm_to_vmem [thread:$0]  %s1038_s2, 1024, %s42_s28, [#allocation7], %s980_s20, %s980_s20, %s981_s21  }
  0x22   :  { %972 = dma.done.wait [#allocation4], 1024  }
  0x23   :  { %973 = vsyncadd [#allocation4], 4294966272 }
  0x24   :  { %974 = dma.done.wait [#allocation7], 2048  }
  0x25   :  { %975 = vsyncadd [#allocation7], 4294965248  ;;  %v868_v0 = vld [vmem:[#allocation8 + $0x38] sm:$0xff]   ;;  %v869_v1 = vld [vmem:[#allocation8 + $0x30] sm:$0xff]  }
  0x26   :  { %798 = vmatprep.subr.bf16.mxu0 %v868_v0  ;;  %v870_v2 = vld [vmem:[#allocation8 + $0x28] sm:$0xff]   ;;  %v871_v3 = vld [vmem:[#allocation8 + $0x20] sm:$0xff]   ;;  %v872_v5 = vld [vmem:[#allocation8 + $0x18] sm:$0xff]  }
  0x27   :  { %799 = vmatpush3.bf16.msra.mxu0 %v868_v0  ;;  %v876_v4 = vld [vmem:[#allocation3] sm:$0xff]   ;;  %v873_v6 = vld [vmem:[#allocation8 + $0x10] sm:$0xff]   ;;  %v874_v7 = vld [vmem:[#allocation8 + $0x8] sm:$0xff]  }
  0x28   :  { %800 = vmatprep.subr.bf16.mxu0 %v869_v1  ;;  %814 = vmatprep.mubr.bf16.mxu0 %v876_v4  ;;  %v875_v8 = vld [vmem:[#allocation8] sm:$0xff]   ;;  %v877_v9 = vld [vmem:[#allocation3 + $0x8] sm:$0xff]   ;;  %v878_v10 = vld [vmem:[#allocation3 + $0x10] sm:$0xff]  }
  0x29   :  { %v879_v11 = vld [vmem:[#allocation3 + $0x18] sm:$0xff]   ;;  %v880_v12 = vld [vmem:[#allocation3 + $0x20] sm:$0xff]   ;;  %v881_v13 = vld [vmem:[#allocation3 + $0x28] sm:$0xff]  }
  0x2a   :  { %v882_v14 = vld [vmem:[#allocation3 + $0x30] sm:$0xff]   ;;  %v883_v15 = vld [vmem:[#allocation3 + $0x38] sm:$0xff]   ;;  %v884_v16 = vld [vmem:[#allocation6] sm:$0xff]  }
  0x2b   :  { %801 = vmatpush3.bf16.msra.mxu0 %v869_v1  ;;  %846 = vmatprep.mubr.bf16.mxu1 %v884_v16  ;;  %v885_v41 = vld [vmem:[#allocation6 + $0x8] sm:$0xff]   ;;  %v886_v42 = vld [vmem:[#allocation6 + $0x10] sm:$0xff]   ;;  %v887_v43 = vld [vmem:[#allocation6 + $0x18] sm:$0xff]  }
  0x2c   :  { %802 = vmatprep.subr.bf16.mxu0 %v870_v2  ;;  %v888_v44 = vld [vmem:[#allocation6 + $0x20] sm:$0xff]   ;;  %v889_v45 = vld [vmem:[#allocation6 + $0x28] sm:$0xff]   ;;  %v890_v46 = vld [vmem:[#allocation6 + $0x30] sm:$0xff]  }
  0x2d   :  { %v891_v47 = vld [vmem:[#allocation6 + $0x38] sm:$0xff]   ;;  %v678_v49 = vld [vmem:[%s1039_s3] ss:$0 sm:$0xff]  ;;  %s983_s3 = smov [#allocation9]  }
  0x2e   :  { %s649_s5 = sshll.u32 %s983_s3, 4  ;;  %s650_s5 = int_to_ptr.vmem [resolvable:$true] %s649_s5 }
  0x2f   :  { %803 = vmatpush3.bf16.msra.mxu0 %v870_v2  ;;  %s952_s6 = scalar_lea.vmem %s650_s5, 1024  ;;  %p957_p2 = scmp.lt.s32.totalorder %s650_s5, %s650_s5 }
  0x30   :  { %804 = vmatprep.subr.bf16.mxu0 %v871_v3  ;;  %p953_p1 = scmp.ne.s32.totalorder %s650_s5, %s952_s6  ;;  %p958_p3 = scmp.lt.s32.totalorder %s952_s6, %s952_s6 }
  0x32   :  { %p959_p4 = por %p958_p3, %p957_p2 }
  0x33   :  { %805 = vmatpush3.bf16.msra.mxu0 %v871_v3 }
  0x34   :  { %806 = vmatprep.subr.bf16.mxu0 %v872_v5  ;;  %p960_p5 = pnand %p959_p4, %p953_p1 }
  0x37   :  { %807 = vmatpush3.bf16.msra.mxu0 %v872_v5 }
  0x38   :  { %808 = vmatprep.subr.bf16.mxu0 %v873_v6 }
  0x3b   :  { %809 = vmatpush3.bf16.msra.mxu0 %v873_v6 }
  0x3c   :  { %810 = vmatprep.subr.bf16.mxu0 %v874_v7 }
  0x3f   :  { %811 = vmatpush3.bf16.msra.mxu0 %v874_v7 }
  0x40   :  { %812 = vmatprep.subr.bf16.mxu0 %v875_v8 }
  0x43   :  { %813 = vmatpush3.bf16.msra.mxu0 %v875_v8 }
  0x46   :  { %815 = vmatmul.mubr.bf16.vlgmr.msra.gmra.mxu0 %v877_v9 }
  0x47   :  { %818 = vmatprep.mubr.bf16.mxu0 %v878_v10 }
  0x4e   :  { %819 = vmatmul.mubr.bf16.gmra.mxu0 %v879_v11 }
  0x4f   :  { %822 = vmatprep.mubr.bf16.mxu0 %v880_v12 }
  0x56   :  { %823 = vmatmul.mubr.bf16.gmra.mxu0 %v881_v13 }
  0x57   :  { %826 = vmatprep.mubr.bf16.mxu0 %v882_v14 }
  0x5e   :  { %827 = vmatmul.mubr.bf16.gmra.mxu0 %v883_v15 }
 0x106   :  { %v816_v17 = vpop.f32.mrf.mxu0 }
 0x108   :  { %v258_v18 = vpop.f32.mrf.mxu0 }
 0x10a   :  { %v817_v19 = vpop.f32.mrf.mxu0 }
 0x10b   :  { %v389_v39 = vpack.c.bf16 %v817_v19, %v816_v17 }
 0x10c   :  { %v261_v20 = vpop.f32.mrf.mxu0 }
 0x10d   :  { %v388_v40 = vpack.c.bf16 %v261_v20, %v258_v18 }
 0x10e   :  { %v820_v21 = vpop.f32.mrf.mxu0 }
 0x110   :  { %v274_v22 = vpop.f32.mrf.mxu0 }
 0x112   :  { %v821_v23 = vpop.f32.mrf.mxu0 }
 0x113   :  { %v391_v37 = vpack.c.bf16 %v821_v23, %v820_v21 }
 0x114   :  { %v277_v24 = vpop.f32.mrf.mxu0 }
 0x115   :  { %v390_v38 = vpack.c.bf16 %v277_v24, %v274_v22 }
 0x116   :  { %v824_v25 = vpop.f32.mrf.mxu0 }
 0x118   :  { %v290_v26 = vpop.f32.mrf.mxu0 }
 0x11a   :  { %v825_v27 = vpop.f32.mrf.mxu0 }
 0x11b   :  { %v393_v35 = vpack.c.bf16 %v825_v27, %v824_v25 }
 0x11c   :  { %v293_v28 = vpop.f32.mrf.mxu0 }
 0x11d   :  { %v392_v36 = vpack.c.bf16 %v293_v28, %v290_v26 }
 0x11e   :  { %v828_v29 = vpop.f32.mrf.mxu0 }
 0x120   :  { %v306_v30 = vpop.f32.mrf.mxu0 }
 0x122   :  { %v829_v31 = vpop.f32.mrf.mxu0 }
 0x123   :  { %v395_v32 = vpack.c.bf16 %v829_v31, %v828_v29 }
 0x124   :  { %v309_v33 = vpop.f32.mrf.mxu0 }
 0x125   :  { %v394_v34 = vpack.c.bf16 %v309_v33, %v306_v30  ;;  %830 = vmatprep.subr.bf16.mxu1 %v395_v32 }
 0x126   :  { %831 = vmatpush3.bf16.msra.mxu1 %v395_v32 }
 0x127   :  { %832 = vmatprep.subr.bf16.mxu1 %v394_v34 }
 0x12a   :  { %833 = vmatpush3.bf16.msra.mxu1 %v394_v34 }
 0x12b   :  { %834 = vmatprep.subr.bf16.mxu1 %v393_v35 }
 0x12e   :  { %835 = vmatpush3.bf16.msra.mxu1 %v393_v35 }
 0x12f   :  { %836 = vmatprep.subr.bf16.mxu1 %v392_v36 }
 0x132   :  { %837 = vmatpush3.bf16.msra.mxu1 %v392_v36 }
 0x133   :  { %838 = vmatprep.subr.bf16.mxu1 %v391_v37 }
 0x136   :  { %839 = vmatpush3.bf16.msra.mxu1 %v391_v37 }
 0x137   :  { %840 = vmatprep.subr.bf16.mxu1 %v390_v38 }
 0x13a   :  { %841 = vmatpush3.bf16.msra.mxu1 %v390_v38 }
 0x13b   :  { %842 = vmatprep.subr.bf16.mxu1 %v389_v39 }
 0x13e   :  { %843 = vmatpush3.bf16.msra.mxu1 %v389_v39 }
 0x13f   :  { %844 = vmatprep.subr.bf16.mxu1 %v388_v40 }
 0x142   :  { %845 = vmatpush3.bf16.msra.mxu1 %v388_v40 }
 0x145   :  { %847 = vmatmul.mubr.bf16.vlgmr.msra.gmra.mxu1 %v885_v41 }
 0x146   :  { %850 = vmatprep.mubr.bf16.mxu1 %v886_v42 }
 0x14d   :  { %851 = vmatmul.mubr.bf16.gmra.mxu1 %v887_v43 }
 0x14e   :  { %854 = vmatprep.mubr.bf16.mxu1 %v888_v44 }
 0x155   :  { %855 = vmatmul.mubr.bf16.gmra.mxu1 %v889_v45 }
 0x156   :  { %858 = vmatprep.mubr.bf16.mxu1 %v890_v46 }
 0x15d   :  { %859 = vmatmul.mubr.bf16.gmra.mxu1 %v891_v47 }
 0x205   :  { %v848_v48 = vpop.f32.mrf.mxu1 }
 0x206   :  { %v494_v51 = vadd.f32 %v848_v48, %v678_v49 }
 0x207   :  { %v485_v50 = vpop.f32.mrf.mxu1 }
 0x208   :  { %v486_v53 = vadd.f32 %v678_v49, %v485_v50  ;;  %v550_v56 = vmax.f32 %v494_v51, 0.0 }
 0x209   :  { %v849_v52 = vpop.f32.mrf.mxu1 }
 0x20a   :  { %v497_v54 = vadd.f32 %v849_v52, %v678_v49  ;;  %v548_v60 = vmax.f32 %v486_v53, 0.0 }
 0x20b   :  { %v488_v55 = vpop.f32.mrf.mxu1 }
 0x20c   :  { %v551_v57 = vmax.f32 %v497_v54, 0.0  ;;  %v489_v58 = vadd.f32 %v678_v49, %v488_v55 }
 0x20d   :  { %v852_v59 = vpop.f32.mrf.mxu1 }
 0x20e   :  { %v727_v61 = vpack.c.bf16 %v551_v57, %v550_v56  ;;  %v549_v62 = vmax.f32 %v489_v58, 0.0  ;;  %v510_v1 = vadd.f32 %v852_v59, %v678_v49 }
 0x20f   :  { %v501_v63 = vpop.f32.mrf.mxu1 }
 0x210   :  { %759 = vst [vmem:[#allocation9 + $0x8] sm:$0xff] %v727_v61   ;;  %v722_v0 = vpack.c.bf16 %v549_v62, %v548_v60  ;;  %v502_v3 = vadd.f32 %v678_v49, %v501_v63  ;;  %v554_v6 = vmax.f32 %v510_v1, 0.0 }
 0x211   :  { %v853_v2 = vpop.f32.mrf.mxu1 }
 0x212   :  { %723 = vst [vmem:[#allocation9] sm:$0xff] %v722_v0   ;;  %v513_v4 = vadd.f32 %v853_v2, %v678_v49  ;;  %v552_v10 = vmax.f32 %v502_v3, 0.0 }
 0x213   :  { %v504_v5 = vpop.f32.mrf.mxu1 }
 0x214   :  { %v555_v7 = vmax.f32 %v513_v4, 0.0  ;;  %v505_v8 = vadd.f32 %v678_v49, %v504_v5 }
 0x215   :  { %v856_v9 = vpop.f32.mrf.mxu1 }
 0x216   :  { %v737_v11 = vpack.c.bf16 %v555_v7, %v554_v6  ;;  %v553_v12 = vmax.f32 %v505_v8, 0.0  ;;  %v526_v15 = vadd.f32 %v856_v9, %v678_v49 }
 0x217   :  { %v517_v13 = vpop.f32.mrf.mxu1 }
 0x218   :  { %761 = vst [vmem:[#allocation9 + $0x18] sm:$0xff] %v737_v11   ;;  %v732_v14 = vpack.c.bf16 %v553_v12, %v552_v10  ;;  %v518_v17 = vadd.f32 %v678_v49, %v517_v13  ;;  %v558_v20 = vmax.f32 %v526_v15, 0.0 }
 0x219   :  { %v857_v16 = vpop.f32.mrf.mxu1 }
 0x21a   :  { %760 = vst [vmem:[#allocation9 + $0x10] sm:$0xff] %v732_v14   ;;  %v529_v18 = vadd.f32 %v857_v16, %v678_v49  ;;  %v556_v24 = vmax.f32 %v518_v17, 0.0 }
 0x21b   :  { %v520_v19 = vpop.f32.mrf.mxu1 }
 0x21c   :  { %v559_v21 = vmax.f32 %v529_v18, 0.0  ;;  %v521_v22 = vadd.f32 %v678_v49, %v520_v19 }
 0x21d   :  { %v860_v23 = vpop.f32.mrf.mxu1 }
 0x21e   :  { %v747_v25 = vpack.c.bf16 %v559_v21, %v558_v20  ;;  %v557_v26 = vmax.f32 %v521_v22, 0.0  ;;  %v542_v29 = vadd.f32 %v860_v23, %v678_v49 }
 0x21f   :  { %v533_v27 = vpop.f32.mrf.mxu1 }
 0x220   :  { %763 = vst [vmem:[#allocation9 + $0x28] sm:$0xff] %v747_v25   ;;  %v742_v28 = vpack.c.bf16 %v557_v26, %v556_v24  ;;  %v534_v31 = vadd.f32 %v678_v49, %v533_v27  ;;  %v562_v34 = vmax.f32 %v542_v29, 0.0 }
 0x221   :  { %v861_v30 = vpop.f32.mrf.mxu1 }
 0x222   :  { %762 = vst [vmem:[#allocation9 + $0x20] sm:$0xff] %v742_v28   ;;  %v545_v32 = vadd.f32 %v861_v30, %v678_v49  ;;  %v560_v37 = vmax.f32 %v534_v31, 0.0 }
 0x223   :  { %v536_v33 = vpop.f32.mrf.mxu1 }
 0x224   :  { %v563_v35 = vmax.f32 %v545_v32, 0.0  ;;  %v537_v36 = vadd.f32 %v678_v49, %v536_v33 }
 0x226   :  { %v757_v38 = vpack.c.bf16 %v563_v35, %v562_v34  ;;  %v561_v39 = vmax.f32 %v537_v36, 0.0 }
 0x228   :  { %765 = vst [vmem:[#allocation9 + $0x38] sm:$0xff] %v757_v38   ;;  %v752_v40 = vpack.c.bf16 %v561_v39, %v560_v37 }
 0x22a   :  { %764 = vst [vmem:[#allocation9 + $0x30] sm:$0xff] %v752_v40  }
 0x22b   :  { %963 = shalt.err (!%p960_p5)
}
 0x22c   :  { %655 = dma.vmem_to_hbm [thread:$0]  %s650_s5, 1024, %s1040_s4, [#allocation5], %s980_s20, %s980_s20, %s981_s21  }
 0x22d   :  { %976 = dma.done.wait [#allocation5], 1024  }
 0x22e   :  { %977 = vsyncadd [#allocation5], 4294966272 }
 0x22f   :  { %659 = vsyncpa [#allocation4], 1 }
 0x230   :  { %660 = vsyncpa [#allocation7], 1 }
 0x231   :  { %661 = vsyncpa [#allocation5], 1 }

</bundles_post_ra>
